<compile_context>
chip_gen: v5e
topology: v5e:2x2
jax: 0.10.0
libtpu: 0.0.40
codegen_flags: <defaults>
</compile_context>

<pallas_src>
import jax
import jax.numpy as jnp
from jax import lax
from jax.experimental import pallas as pl
from jax.experimental.pallas import tpu as pltpu

BN_EPS = 1e-5


def fused_conv_bn_relu_kernel(w_ref, xcol_ref, bias_ref, gamma_ref, beta_ref, o_ref):
    """Fused Conv1d (one MXU matmul) + BatchNorm1d (batch stats) + ReLU.

    w_ref    : (C_out, C_in*K)    bf16  folded conv weight
    xcol_ref : (C_in*K, N*L_out)  bf16  im2col slab (lane axis = batch * length)
    bias_ref : (C_out, 1)         f32   conv bias
    gamma_ref: (C_out, 1)         f32   BatchNorm weight
    beta_ref : (C_out, 1)         f32   BatchNorm bias
    o_ref    : (C_out, N*L_out)   f32   fused output (lane-dense)
    """
    # Conv1d over the whole batch as a single MXU matmul, f32 accumulation.
    y = jnp.dot(w_ref[...], xcol_ref[...], preferred_element_type=jnp.float32)
    y = y + bias_ref[...]

    # Training-mode BatchNorm statistics over all N*L_out positions per channel
    # (biased variance, matching PyTorch's normalization path). Centered
    # computation avoids E[x^2] - E[x]^2 catastrophic cancellation.
    inv_count = 1.0 / y.shape[-1]
    mean = jnp.sum(y, axis=-1, keepdims=True) * inv_count
    yc = y - mean
    var = jnp.sum(yc * yc, axis=-1, keepdims=True) * inv_count
    scale = gamma_ref[...] * lax.rsqrt(var + BN_EPS)

    # BN affine + ReLU. Dropout(p=0.5) uses eval-mode identity semantics here.
    # TODO(synk): training-mode dropout would add pltpu.prng_seed /
    # pltpu.prng_random_bits masking plus a 1/(1-p) rescale at this point.
    o_ref[...] = jnp.maximum(yc * scale + beta_ref[...], 0.0)


def _vmem_limit_bytes():
    """Scoped-VMEM budget gated on the actual chip (v7x has 64 MiB physical)."""
    try:
        cap = pltpu.get_tpu_info().vmem_capacity_bytes
    except Exception:  # pragma: no cover - conservative fallback
        cap = 64 * 1024 * 1024
    return int(min(cap // 2, 64 * 1024 * 1024))


def conv_block_forward(x, weight, bias, gamma, beta, padding):
    """ConvBlock forward. x: (N, C_in, L) f32 -> (N, C_out, L_out) f32."""
    N, C_in, L = x.shape
    C_out, _, K = weight.shape
    L_out = L + 2 * padding - K + 1

    # Host-side glue (cheap XLA layout work at these sizes):
    #   * zero-pad length, build the (K*C_in, N*L_out) im2col slab in bf16,
    #   * fold the weight to (C_out, K*C_in) bf16 with matching row order,
    #   * reshape per-channel params to (C_out, 1) f32 broadcast columns.
    x_pad = jnp.pad(x, ((0, 0), (0, 0), (padding, padding)))
    cols = jnp.stack([x_pad[:, :, k:k + L_out] for k in range(K)], axis=0)  # (K,N,C_in,L_out)
    x_col = (jnp.transpose(cols, (0, 2, 1, 3))                              # (K,C_in,N,L_out)
             .reshape(K * C_in, N * L_out)
             .astype(jnp.bfloat16))
    w2 = (jnp.transpose(weight, (0, 2, 1))                                  # (C_out,K,C_in)
          .reshape(C_out, K * C_in)
          .astype(jnp.bfloat16))
    bias2 = bias.astype(jnp.float32).reshape(C_out, 1)
    gamma2 = gamma.astype(jnp.float32).reshape(C_out, 1)
    beta2 = beta.astype(jnp.float32).reshape(C_out, 1)

    out2d = pl.pallas_call(
        fused_conv_bn_relu_kernel,
        out_shape=jax.ShapeDtypeStruct((C_out, N * L_out), jnp.float32),
        compiler_params=pltpu.CompilerParams(
            vmem_limit_bytes=_vmem_limit_bytes(),
        ),
    )(w2, x_col, bias2, gamma2, beta2)

    # Lane-major (C_out, N*L_out) -> PyTorch layout (N, C_out, L_out).
    return jnp.transpose(out2d.reshape(C_out, N, L_out), (1, 0, 2))


def ref_forward(x, weight, bias, gamma, beta, padding):
    """Pure-JAX f32 reference: Conv1d -> training-mode BN -> ReLU."""
    K = weight.shape[-1]
    L_out = x.shape[-1] + 2 * padding - K + 1
    xp = jnp.pad(x, ((0, 0), (0, 0), (padding, padding)))
    patches = jnp.stack([xp[:, :, k:k + L_out] for k in range(K)], axis=-1)  # (N,C_in,L_out,K)
    y = jnp.einsum('nclk,ock->nol', patches, weight) + bias[None, :, None]
    mean = jnp.mean(y, axis=(0, 2), keepdims=True)
    var = jnp.mean((y - mean) ** 2, axis=(0, 2), keepdims=True)
    yhat = (y - mean) * lax.rsqrt(var + BN_EPS)
    return jnp.maximum(yhat * gamma[None, :, None] + beta[None, :, None], 0.0)


if __name__ == "__main__":
    key = jax.random.PRNGKey(0)
    k_x, k_w, k_b = jax.random.split(key, 3)

    # ConvBlock(in_channels=4, out_channels=8, kernel_size=3, padding=1)
    # on input (N=2, C_in=4, L=16).
    N, C_in, C_out, L, K, padding = 2, 4, 8, 16, 3, 1
    L_out = L + 2 * padding - K + 1

    x = jax.random.normal(k_x, (N, C_in, L), dtype=jnp.float32)

    # Deterministic parameter init (PyTorch-like uniform fan-in scaling).
    fan_in = C_in * K
    bound = 1.0 / (fan_in ** 0.5)
    weight = jax.random.uniform(k_w, (C_out, C_in, K), jnp.float32, -bound, bound)
    bias = jax.random.uniform(k_b, (C_out,), jnp.float32, -bound, bound)
    gamma = jnp.ones((C_out,), jnp.float32)   # BatchNorm weight
    beta = jnp.zeros((C_out,), jnp.float32)   # BatchNorm bias

    out = conv_block_forward(x, weight, bias, gamma, beta, padding)
    jax.block_until_ready(out)

    assert out.shape == (N, C_out, L_out), out.shape
    assert bool(jnp.all(out >= 0.0))  # ReLU post-condition

    # bf16 MXU inputs -> allow ~1e-2-scale deviation vs. the f32 reference.
    ref = ref_forward(x, weight, bias, gamma, beta, padding)
    max_err = float(jnp.max(jnp.abs(out - ref)))
    assert max_err < 7.5e-2, f"max abs err {max_err}"

    print("KERNEL_OK")
</pallas_src>

<mosaic_0001>
module attributes {stable_mosaic.version = 11 : i64} {
  func.func @fused_conv_bn_relu_kernel(%arg0: memref<8x12xbf16, #tpu.memory_space<vmem>>, %arg1: memref<12x32xbf16, #tpu.memory_space<vmem>>, %arg2: memref<8x1xf32, #tpu.memory_space<vmem>>, %arg3: memref<8x1xf32, #tpu.memory_space<vmem>>, %arg4: memref<8x1xf32, #tpu.memory_space<vmem>>, %arg5: memref<8x32xf32, #tpu.memory_space<vmem>>) attributes {dimension_semantics = [], scalar_prefetch = 0 : i64, scratch_operands = 0 : i64, tpu.core_type = #tpu.core_type<tc>} {
    %c0 = arith.constant 0 : index
    %c0_0 = arith.constant 0 : index
    %0 = vector.load %arg0[%c0, %c0_0] : memref<8x12xbf16, #tpu.memory_space<vmem>>, vector<8x12xbf16>
    %c0_1 = arith.constant 0 : index
    %c0_2 = arith.constant 0 : index
    %1 = vector.load %arg1[%c0_1, %c0_2] : memref<12x32xbf16, #tpu.memory_space<vmem>>, vector<12x32xbf16>
    %cst = arith.constant dense<0.000000e+00> : vector<8x32xf32>
    %2 = tpu.matmul %0, %1, %cst {dimension_numbers = #tpu.dot_dimension_numbers<[1], [0], [0], [1], [0, 0, 1, 1], [], []>} : vector<8x12xbf16>, vector<12x32xbf16>, vector<8x32xf32> -> vector<8x32xf32>
    %c0_3 = arith.constant 0 : index
    %c0_4 = arith.constant 0 : index
    %3 = vector.load %arg2[%c0_3, %c0_4] : memref<8x1xf32, #tpu.memory_space<vmem>>, vector<8x1xf32>
    %4 = vector.broadcast %3 : vector<8x1xf32> to vector<8x32xf32>
    %5 = arith.addf %2, %4 : vector<8x32xf32>
    %cst_5 = arith.constant dense<0.000000e+00> : vector<8xf32>
    %6 = vector.multi_reduction <add>, %5, %cst_5 [1] : vector<8x32xf32> to vector<8xf32>
    %7 = vector.shape_cast %6 : vector<8xf32> to vector<8x1xf32>
    %cst_6 = arith.constant 3.125000e-02 : f32
    %8 = vector.broadcast %cst_6 : f32 to vector<8x1xf32>
    %9 = arith.mulf %7, %8 : vector<8x1xf32>
    %10 = vector.broadcast %9 : vector<8x1xf32> to vector<8x32xf32>
    %11 = arith.subf %5, %10 : vector<8x32xf32>
    %12 = arith.mulf %11, %11 : vector<8x32xf32>
    %cst_7 = arith.constant dense<0.000000e+00> : vector<8xf32>
    %13 = vector.multi_reduction <add>, %12, %cst_7 [1] : vector<8x32xf32> to vector<8xf32>
    %14 = vector.shape_cast %13 : vector<8xf32> to vector<8x1xf32>
    %cst_8 = arith.constant 3.125000e-02 : f32
    %15 = vector.broadcast %cst_8 : f32 to vector<8x1xf32>
    %16 = arith.mulf %14, %15 : vector<8x1xf32>
    %c0_9 = arith.constant 0 : index
    %c0_10 = arith.constant 0 : index
    %17 = vector.load %arg3[%c0_9, %c0_10] : memref<8x1xf32, #tpu.memory_space<vmem>>, vector<8x1xf32>
    %cst_11 = arith.constant 9.99999974E-6 : f32
    %18 = vector.broadcast %cst_11 : f32 to vector<8x1xf32>
    %19 = arith.addf %16, %18 : vector<8x1xf32>
    %20 = math.rsqrt %19 : vector<8x1xf32>
    %21 = arith.mulf %17, %20 : vector<8x1xf32>
    %22 = vector.broadcast %21 : vector<8x1xf32> to vector<8x32xf32>
    %23 = arith.mulf %11, %22 : vector<8x32xf32>
    %c0_12 = arith.constant 0 : index
    %c0_13 = arith.constant 0 : index
    %24 = vector.load %arg4[%c0_12, %c0_13] : memref<8x1xf32, #tpu.memory_space<vmem>>, vector<8x1xf32>
    %25 = vector.broadcast %24 : vector<8x1xf32> to vector<8x32xf32>
    %26 = arith.addf %23, %25 : vector<8x32xf32>
    %cst_14 = arith.constant 0.000000e+00 : f32
    %27 = vector.broadcast %cst_14 : f32 to vector<8x32xf32>
    %28 = arith.maximumf %26, %27 : vector<8x32xf32>
    %c0_15 = arith.constant 0 : index
    %c0_16 = arith.constant 0 : index
    %29 = vector.load %arg5[%c0_15, %c0_16] : memref<8x32xf32, #tpu.memory_space<vmem>>, vector<8x32xf32>
    tpu.vector_store %arg5[%c0_15, %c0_16], %28 {strides = array<i32>} : memref<8x32xf32, #tpu.memory_space<vmem>>, vector<8x32xf32>,
    return
  }
}

</mosaic_0001>

<bundles_post_ra>
// kernel: tpu_custom_call.1
= control target key start
LH: loop header
LB: loop body
LE: loop exit
PB: predicated region body
PF: predicated region fallthrough
CT: control target
= control target key end

     0   :  { %vm40_vm0 = vcmask 1045504   ;;  %s207_s0 = inlined_call_operand.vmem [shape: bf16[8,12], index: 0, kind: input, shape index: {}]   ;;  %s208_s1 = inlined_call_operand.vmem [shape: bf16[12,32], index: 1, kind: input, shape index: {}]   ;;  %s209_s2 = inlined_call_operand.vmem [shape: f32[8,1], index: 2, kind: input, shape index: {}]   ;;  %s210_s3 = inlined_call_operand.vmem [shape: f32[8,1], index: 3, kind: input, shape index: {}]   ;;  %s211_s4 = inlined_call_operand.vmem [shape: f32[8,1], index: 4, kind: input, shape index: {}]   ;;  %s212_s5 = inlined_call_operand.hbm [shape: f32[8,32], index: 5, kind: output, shape index: {}]  }
   0x1   :  { %v114_v0 = vld [vmem:[%s208_s1] sm:$0xf]  ;;  %v117_v1 = vld [vmem:[%s208_s1] sm:$0x30] }
   0x2   :  { %v115_v2 = vor.u32 %v117_v1, %v114_v0  ;;  %v25_v3 = vld [vmem:[%s209_s2] sm:$0xff] }
   0x3   :  { %10 = vsyncpa [#allocation3], 0  ;;  %v151_v4 = vmov 0   ;;  %v22_v6 = vld [vmem:[%s207_s0] sm:$0xf]  ;;  %vm36_vm1 = vcmask 97280  }
   0x4   :  { %120 = vset.pattern.permute.xlu0 %v151_v4  ;;  %121 = vset.pattern.permute.xlu1 %v151_v4  ;;  %v42_v5 = vsel %vm40_vm0, %v115_v2, 0  ;;  %vm57_vm2 = vcmask 261120   ;;  %v87_v17 = vld [vmem:[%s211_s4] sm:$0xff]  ;;  %s152_s4 = smov [#allocation2]   ;;  %s103_s30 = sshll.u32 %s212_s5, 4  ;;  %s104_s30 = int_to_ptr.hbm [resolvable:$true] %s103_s30 }
   0x5   :  { %28 = vperm.xlu0 %120, %v25_v3   ;;  %122 = vset.pattern.permute.xlu2 %v151_v4  ;;  %v68_v26 = vld [vmem:[%s210_s3] sm:$0xff]  ;;  %s101_s27 = sshll.u32 %s152_s4, 4  ;;  %s102_s27 = int_to_ptr.vmem [resolvable:$true] %s101_s27 }
   0x6   :  { %51 = vmatpush.bf16.msra.mxu0 %v42_v5  ;;  %90 = vperm.xlu2 %122, %v87_v17  }
   0x9   :  { %116 = vmatmul.msk.bf16.vlgmr.msra.gmra.mxu0 %vm36_vm1, %v22_v6 }
  0x60   :  { %v91_v31 = vpop.permute.xlu2 %90 }
  0x77   :  { %v29_v7 = vpop.permute.xlu0 %28 }
  0x86   :  { %v53_v8 = vpop.f32.mrf.mxu0 }
  0x87   :  { %v54_v9 = vadd.f32 %v53_v8, %v29_v7 }
  0x89   :  { %v58_v10 = vsel %vm57_vm2, %v54_v9, 0.0 }
  0x8a   :  { %59 = vadd.xlane.f32.xlu0 %v58_v10 }
  0x8e   :  { %v55_v11 = vpop.f32.mrf.mxu0 }
  0xfd   :  { %v60_v12 = vpop.xlane.xlu0 %59 }
  0xfe   :  { %v61_v13 = vmul.f32 0.03125, %v60_v12 }
 0x100   :  { %v62_v14 = vsub.f32 %v54_v9, %v61_v13 }
 0x102   :  { %v63_v15 = vmul.f32 %v62_v14, %v62_v14 }
 0x104   :  { %v64_v16 = vsel %vm57_vm2, %v63_v15, 0.0 }
 0x105   :  { %65 = vadd.xlane.f32.xlu1 %v64_v16 }
 0x178   :  { %v66_v18 = vpop.xlane.xlu1 %65 }
 0x179   :  { %v67_v19 = vmul.f32 0.03125, %v66_v18 }
 0x17b   :  { %v69_v20 = vadd.f32 1e-05, %v67_v19 }
 0x17d   :  { %123 = vrsqrt.f32 %v69_v20  ;;  %vm76_vm4 = vweird.f32 %v69_v20 }
 0x183   :  { %v124_v21 = vpop.eup %123 }
 0x184   :  { %v71_v22 = vmul.f32 %v124_v21, %v69_v20  ;;  %vm77_vm3 = vweird.f32 %v124_v21 }
 0x185   :  { %vm78_vm5 = vmor %vm76_vm4, %vm77_vm3 }
 0x186   :  { %v72_v23 = vmul.f32 %v124_v21, %v71_v22 }
 0x188   :  { %v73_v24 = vmul.f32 0.5, %v72_v23 }
 0x18a   :  { %v74_v25 = vsub.f32 1.5, %v73_v24 }
 0x18c   :  { %v75_v27 = vmul.f32 %v124_v21, %v74_v25 }
 0x18e   :  { %v79_v28 = vsel %vm78_vm5, %v124_v21, %v75_v27 }
 0x18f   :  { %v80_v29 = vmul.f32 %v79_v28, %v68_v26 }
 0x191   :  { %83 = vperm.xlu1 %121, %v80_v29  }
 0x203   :  { %v84_v30 = vpop.permute.xlu1 %83 }
 0x204   :  { %v86_v32 = vmul.f32 %v84_v30, %v62_v14 }
 0x206   :  { %v93_v33 = vadd.f32 %v91_v31, %v86_v32 }
 0x208   :  { %v94_v34 = vmax.f32 %v93_v33, 0.0 }
 0x20a   :  { %95 = vst.msk [vmem:[#allocation2] sm:$0xff] %vm57_vm2, %v94_v34 }
 0x20b   :  { %106 = dma.vmem_to_hbm [thread:$0]  %s102_s27, 128, %s104_s30, [#allocation3]  }
 0x20c   :  { %149 = dma.done.wait [#allocation3], 128  }
 0x20d   :  { %150 = vsyncadd [#allocation3], 4294967168 }
 0x20e   :  { %111 = vsyncpa [#allocation3], 1 }

</bundles_post_ra>
